<compile_context>
chip_gen: v6e
topology: v6e:2x2x1
jax: 0.10.0
libtpu: 0.0.40
codegen_flags: <defaults>
</compile_context>

<pallas_src>
import functools

import jax
import jax.numpy as jnp
from jax import lax
from jax.experimental import pallas as pl
from jax.experimental.pallas import tpu as pltpu


# ---------------------------------------------------------------------------
# Fuzzy-logic OR (t-conorm) selection.  The hybrid_learning `Logic` / `Merge`
# object dispatch has no Pallas equivalent; the logic is chosen statically.
# TODO(synk): only the four named t-conorms are supported; arbitrary Logic
#             objects would need their own merge expression here.
# ---------------------------------------------------------------------------
def _merge_fn(name: str):
    name = name.lower()
    if name in ("goedel", "max", "boolean"):
        return lambda a, b: jnp.maximum(a, b)
    if name == "product":
        return lambda a, b: a + b - a * b
    if name == "lukasiewicz":
        return lambda a, b: jnp.minimum(a + b, 1.0)
    raise ValueError(f"unknown fuzzy logic: {name}")


def _round_up(x: int, m: int) -> int:
    return (x + m - 1) // m * m


# ---------------------------------------------------------------------------
# Pallas kernel: one grid step == one (image, row-tile) pair.
#   n_live_ref : SMEM (B,) int32            -- scalar-prefetched live counts
#   det_ref    : SMEM (1, 5, MAX_DET) f32   -- compacted, transposed table
#                rows: x_min, y_min, x_max, y_max, value
#   out_ref    : VMEM (1, 1, tile_h, W_pad) f32
# ---------------------------------------------------------------------------
def _bbox_to_segmask_kernel(n_live_ref, det_ref, out_ref, *,
                            tile_h, width, merge_name):
    b = pl.program_id(0)
    row0 = pl.program_id(1) * tile_h

    # Hoisted coordinate vectors (computed once per tile, not per detection).
    ys = (row0 + lax.broadcasted_iota(jnp.int32, (tile_h, 1), 0)
          ).astype(jnp.float32)                                    # (tile_h, 1)
    xs = lax.broadcasted_iota(jnp.int32, (1, width), 1
                              ).astype(jnp.float32)                # (1, width)
    tile_lo = row0.astype(jnp.float32)
    tile_hi = (row0 + tile_h).astype(jnp.float32)

    # Each grid step owns its output block exclusively: zero-init once, then
    # read-modify-write in place.  merge(acc, 0-mask) is the identity of every
    # supported t-conorm, so skipping non-touching detections is exact.
    out_ref[...] = jnp.zeros_like(out_ref)

    n_live = n_live_ref[b]

    @pl.loop(0, n_live)
    def _(d):
        x_min = det_ref[0, 0, d]
        y_min = det_ref[0, 1, d]
        x_max = det_ref[0, 2, d]
        y_max = det_ref[0, 3, d]
        val = det_ref[0, 4, d]

        # Only detections whose box intersects this row tile touch VMEM.
        touches = (y_max > tile_lo) & (y_min < tile_hi)

        @pl.when(touches)
        def _():
            # Separable half-open box test: (tile_h,1) row mask x (1,W) column
            # mask, with the per-detection value fused into the row factor.
            row_f = ((ys >= y_min) & (ys < y_max)).astype(jnp.float32) * val
            col_f = ((xs >= x_min) & (xs < x_max)).astype(jnp.float32)
            m = row_f * col_f                                  # (tile_h, width)
            a = out_ref[0, 0, :, :]
            if merge_name in ("goedel", "boolean"):
                out_ref[0, 0, :, :] = jnp.maximum(a, m)
            elif merge_name == "product":
                out_ref[0, 0, :, :] = a + m - a * m
            else:  # lukasiewicz
                out_ref[0, 0, :, :] = jnp.minimum(a + m, jnp.float32(1.0))


# ---------------------------------------------------------------------------
# Tile sizing: biggest multiple-of-8 row tile within ~2 MiB of f32 (so the
# double-buffered output stays <= 4 MiB, inside every generation's scoped-VMEM
# default), capped so batch * n_htiles >= 2 and both of v7x's TensorCores get
# a parallel grid step even at batch = 1.
# ---------------------------------------------------------------------------
def _choose_tiling(height, width_pad, batch, tile_budget_bytes=2 << 20):
    h8 = _round_up(height, 8)
    max_rows = max(8, (tile_budget_bytes // (width_pad * 4)) // 8 * 8)
    tile_h = min(h8, max_rows)
    if batch * pl.cdiv(h8, tile_h) < 2 and h8 > 8:
        tile_h = _round_up(pl.cdiv(height, 2), 8)
    h_pad = pl.cdiv(height, tile_h) * tile_h
    return tile_h, h_pad


# ---------------------------------------------------------------------------
# Wrapper (glue): pre-filter + compaction, shapes, BlockSpecs.
# ---------------------------------------------------------------------------
def efficientdet_to_segmask(effdet_out,
                            *,
                            fuzzy_logic: str = "goedel",
                            image_size=(640, 640),
                            target_class: int = 1):
    """JAX/Pallas equivalent of EfficientDetToSegMask.forward.

    effdet_out: (B, MAX_DET, 6) or (MAX_DET, 6) float array, rows are
                [x_min, y_min, x_max, y_max, score, class].
    Returns (B, 1, H, W) float32 segmentation masks.
    """
    effdet = jnp.asarray(effdet_out, dtype=jnp.float32)
    if effdet.ndim == 2:
        effdet = effdet[None]
    batch, max_det, six = effdet.shape
    assert six == 6, "rows must be [x_min,y_min,x_max,y_max,score,class]"
    height, width = image_size

    merge_name = fuzzy_logic.lower()
    _merge_fn(merge_name)  # validate the logic name early

    # ---- wrapper-side pre-filter + compaction (cheap XLA ops) -------------
    x_min, y_min = effdet[..., 0], effdet[..., 1]
    x_max, y_max = effdet[..., 2], effdet[..., 3]
    score, cls = effdet[..., 4], effdet[..., 5]

    is_target = jnp.round(cls).astype(jnp.int32) == int(target_class)
    if merge_name == "boolean":
        # binarized-per-detection: anything below 0.5 contributes nothing.
        keep = is_target & (score >= 0.5)
        val = jnp.ones_like(score)
    else:
        keep = is_target & (score != 0.0)
        val = score
    keep = keep & (x_max > x_min) & (y_max > y_min)  # empty boxes paint nothing

    n_live = jnp.sum(keep, axis=1).astype(jnp.int32)                 # (B,)
    order = jnp.argsort(jnp.logical_not(keep).astype(jnp.int32),
                        axis=1, stable=True)                         # kept first
    table = jnp.stack([x_min, y_min, x_max, y_max, val], axis=-1)    # (B, D, 5)
    table = jnp.where(keep[..., None], table, 0.0)                   # defensive
    table = table[jnp.arange(batch)[:, None], order]                 # compacted
    dets_t = jnp.transpose(table, (0, 2, 1))                         # (B, 5, D)

    # ---- lane/sublane-friendly output padding ------------------------------
    w_pad = _round_up(width, 128)            # lane-dense, unmasked stores
    tile_h, h_pad = _choose_tiling(height, w_pad, batch)
    n_htiles = h_pad // tile_h

    kernel = functools.partial(
        _bbox_to_segmask_kernel,
        tile_h=tile_h, width=w_pad, merge_name=merge_name)

    out = pl.pallas_call(
        kernel,
        # Keep f32 output to match the module; a bf16 cast at the final store
        # would halve HBM writeback if downstream tolerates it.
        out_shape=jax.ShapeDtypeStruct((batch, 1, h_pad, w_pad), jnp.float32),
        grid_spec=pltpu.PrefetchScalarGridSpec(
            num_scalar_prefetch=1,           # n_live lands in SMEM first
            grid=(batch, n_htiles),
            in_specs=[
                # Transposed (long axis last) so SMEM padding stays ~4 KiB;
                # index_map ignores h -> table resident across row tiles.
                pl.BlockSpec((1, 5, max_det),
                             lambda b, h, n_live: (b, 0, 0),
                             memory_space=pltpu.MemorySpace.SMEM),
            ],
            out_specs=pl.BlockSpec((1, 1, tile_h, w_pad),
                                   lambda b, h, n_live: (b, 0, h, 0)),
        ),
        compiler_params=pltpu.CompilerParams(
            dimension_semantics=("parallel", "parallel")),
    )(n_live, dets_t)

    if h_pad != height or w_pad != width:
        out = out[:, :, :height, :width]
    return out


# ---------------------------------------------------------------------------
# Pure-JAX reference for correctness checking (all four logics).
# ---------------------------------------------------------------------------
def _reference(dets, image_size, target_class, fuzzy_logic="goedel"):
    height, width = image_size
    name = fuzzy_logic.lower()
    merge = _merge_fn(name)
    ys = jnp.arange(height, dtype=jnp.float32)[:, None]
    xs = jnp.arange(width, dtype=jnp.float32)[None, :]

    def per_det(row):
        x_min, y_min, x_max, y_max, score, cls = (row[i] for i in range(6))
        is_t = jnp.round(cls).astype(jnp.int32) == target_class
        val = jnp.where(is_t, score, 0.0)
        if name == "boolean":
            val = (val >= 0.5).astype(jnp.float32)
        inside = (ys >= y_min) & (ys < y_max) & (xs >= x_min) & (xs < x_max)
        return jnp.where(inside, val, 0.0)

    def per_image(rows):
        masks = jax.vmap(per_det)(rows)
        acc = jnp.zeros((height, width), jnp.float32)
        for d in range(rows.shape[0]):
            acc = merge(acc, masks[d])
        return acc

    return jax.vmap(per_image)(dets)[:, None]


if __name__ == "__main__":
    # Small, deterministic example shapes (module default image_size is 640x640).
    batch, max_det = 2, 8
    target_class = 1
    key = jax.random.PRNGKey(0)

    # (40, 96) exercises the row/lane padding + slicing path; (64, 128) is
    # already tile-aligned.
    for image_size in ((64, 128), (40, 96)):
        key, k_x, k_y, k_s, k_c = jax.random.split(key, 5)
        xcoords = jnp.sort(jax.random.uniform(
            k_x, (batch, max_det, 2), minval=0.0, maxval=float(image_size[1])), axis=-1)
        ycoords = jnp.sort(jax.random.uniform(
            k_y, (batch, max_det, 2), minval=0.0, maxval=float(image_size[0])), axis=-1)
        scores = jax.random.uniform(k_s, (batch, max_det))
        classes = jax.random.randint(k_c, (batch, max_det), 0, 3).astype(jnp.float32)

        effdet_out = jnp.stack(
            [xcoords[..., 0], ycoords[..., 0], xcoords[..., 1], ycoords[..., 1],
             scores, classes], axis=-1)          # (B, MAX_DET, 6)

        for logic in ("goedel", "product", "lukasiewicz", "boolean"):
            masks = efficientdet_to_segmask(effdet_out,
                                            fuzzy_logic=logic,
                                            image_size=image_size,
                                            target_class=target_class)
            masks = jax.block_until_ready(masks)
            ref = _reference(effdet_out, image_size, target_class, logic)
            assert masks.shape == (batch, 1, *image_size)
            assert jnp.allclose(masks, ref, atol=1e-6), \
                f"kernel mismatch vs reference ({logic}, {image_size})"

    print("KERNEL_OK")
</pallas_src>

<mosaic_0001>
module attributes {stable_mosaic.version = 11 : i64} {
  func.func @_bbox_to_segmask_kernel(%arg0: i32, %arg1: i32, %arg2: memref<2xi32, #tpu.memory_space<smem>>, %arg3: memref<1x5x8xf32, #tpu.memory_space<smem>>, %arg4: memref<1x1x64x128xf32, #tpu.memory_space<vmem>>) attributes {dimension_semantics = [#tpu.dimension_semantics<parallel>, #tpu.dimension_semantics<parallel>], iteration_bounds = array<i64: 2, 1>, scalar_prefetch = 1 : i64, scratch_operands = 0 : i64, tpu.core_type = #tpu.core_type<tc>, window_params = [{transform_indices = @transform_0, window_bounds = array<i64: 1, 5, 8>}, {transform_indices = @transform_1, window_bounds = array<i64: 1, 1, 64, 128>}]} {
    %c64_i32 = arith.constant 64 : i32
    %0 = arith.muli %arg1, %c64_i32 : i32
    %1 = tpu.iota {dimensions = array<i32: 0>} : vector<64x1xi32>
    %2 = vector.broadcast %0 : i32 to vector<64x1xi32>
    %3 = arith.addi %2, %1 : vector<64x1xi32>
    %4 = arith.sitofp %3 : vector<64x1xi32> to vector<64x1xf32>
    %5 = tpu.iota {dimensions = array<i32: 1>} : vector<1x128xi32>
    %6 = arith.sitofp %5 : vector<1x128xi32> to vector<1x128xf32>
    %7 = arith.sitofp %0 : i32 to f32
    %c64_i32_0 = arith.constant 64 : i32
    %8 = arith.addi %0, %c64_i32_0 : i32
    %9 = arith.sitofp %8 : i32 to f32
    %cst = arith.constant 0.000000e+00 : f32
    %10 = vector.broadcast %cst : f32 to vector<1x1x64x128xf32>
    %c0 = arith.constant 0 : index
    %c0_1 = arith.constant 0 : index
    %c0_2 = arith.constant 0 : index
    %c0_3 = arith.constant 0 : index
    %11 = vector.load %arg4[%c0, %c0_1, %c0_2, %c0_3] : memref<1x1x64x128xf32, #tpu.memory_space<vmem>>, vector<1x1x64x128xf32>
    tpu.vector_store %arg4[%c0, %c0_1, %c0_2, %c0_3], %10 {strides = array<i32>} : memref<1x1x64x128xf32, #tpu.memory_space<vmem>>, vector<1x1x64x128xf32>,
    %12 = arith.index_cast %arg0 : i32 to index
    %13 = memref.load %arg2[%12] : memref<2xi32, #tpu.memory_space<smem>>
    %c0_i32 = arith.constant 0 : i32
    %14 = arith.subi %13, %c0_i32 : i32
    %c1_i32 = arith.constant 1 : i32
    %c1_i32_4 = arith.constant 1 : i32
    %15 = arith.subi %c1_i32, %c1_i32_4 : i32
    %16 = arith.addi %14, %15 : i32
    %c1_i32_5 = arith.constant 1 : i32
    %17 = arith.divsi %16, %c1_i32_5 : i32
    %c1_i32_6 = arith.constant 1 : i32
    %c0_i32_7 = arith.constant 0 : i32
    %c0_i32_8 = arith.constant 0 : i32
    %18 = arith.subi %17, %c0_i32_8 : i32
    %19 = arith.addi %c0_i32_8, %18 : i32
    %c1_i32_9 = arith.constant 1 : i32
    scf.for %arg5 = %c0_i32_8 to %19 step %c1_i32_9  : i32 {
      %20 = arith.muli %arg5, %c1_i32_6 : i32
      %21 = arith.addi %c0_i32_7, %20 : i32
      %c0_10 = arith.constant 0 : index
      %c0_11 = arith.constant 0 : index
      %22 = arith.index_cast %21 : i32 to index
      %23 = memref.load %arg3[%c0_10, %c0_11, %22] : memref<1x5x8xf32, #tpu.memory_space<smem>>
      %c0_12 = arith.constant 0 : index
      %c1 = arith.constant 1 : index
      %24 = arith.index_cast %21 : i32 to index
      %25 = memref.load %arg3[%c0_12, %c1, %24] : memref<1x5x8xf32, #tpu.memory_space<smem>>
      %c0_13 = arith.constant 0 : index
      %c2 = arith.constant 2 : index
      %26 = arith.index_cast %21 : i32 to index
      %27 = memref.load %arg3[%c0_13, %c2, %26] : memref<1x5x8xf32, #tpu.memory_space<smem>>
      %c0_14 = arith.constant 0 : index
      %c3 = arith.constant 3 : index
      %28 = arith.index_cast %21 : i32 to index
      %29 = memref.load %arg3[%c0_14, %c3, %28] : memref<1x5x8xf32, #tpu.memory_space<smem>>
      %c0_15 = arith.constant 0 : index
      %c4 = arith.constant 4 : index
      %30 = arith.index_cast %21 : i32 to index
      %31 = memref.load %arg3[%c0_15, %c4, %30] : memref<1x5x8xf32, #tpu.memory_space<smem>>
      %32 = arith.cmpf ogt, %29, %7 : f32
      %33 = arith.cmpf olt, %25, %9 : f32
      %34 = arith.andi %32, %33 : i1
      %35 = arith.extui %34 : i1 to i32
      %c0_i32_16 = arith.constant 0 : i32
      %36 = arith.cmpi ne, %35, %c0_i32_16 : i32
      scf.if %36 {
        %37 = vector.broadcast %25 : f32 to vector<64x1xf32>
        %38 = arith.cmpf oge, %4, %37 : vector<64x1xf32>
        %39 = vector.broadcast %29 : f32 to vector<64x1xf32>
        %40 = arith.cmpf olt, %4, %39 : vector<64x1xf32>
        %41 = arith.andi %38, %40 : vector<64x1xi1>
        %42 = arith.extui %41 : vector<64x1xi1> to vector<64x1xi32>
        %43 = arith.sitofp %42 : vector<64x1xi32> to vector<64x1xf32>
        %44 = vector.broadcast %31 : f32 to vector<64x1xf32>
        %45 = arith.mulf %43, %44 : vector<64x1xf32>
        %46 = vector.broadcast %23 : f32 to vector<1x128xf32>
        %47 = arith.cmpf oge, %6, %46 : vector<1x128xf32>
        %48 = vector.broadcast %27 : f32 to vector<1x128xf32>
        %49 = arith.cmpf olt, %6, %48 : vector<1x128xf32>
        %50 = arith.andi %47, %49 : vector<1x128xi1>
        %51 = arith.extui %50 : vector<1x128xi1> to vector<1x128xi32>
        %52 = arith.sitofp %51 : vector<1x128xi32> to vector<1x128xf32>
        %53 = vector.broadcast %45 : vector<64x1xf32> to vector<64x128xf32>
        %54 = vector.broadcast %52 : vector<1x128xf32> to vector<64x128xf32>
        %55 = arith.mulf %53, %54 : vector<64x128xf32>
        %c0_17 = arith.constant 0 : index
        %c0_18 = arith.constant 0 : index
        %c0_19 = arith.constant 0 : index
        %c0_20 = arith.constant 0 : index
        %56 = vector.load %arg4[%c0_17, %c0_18, %c0_19, %c0_20] : memref<1x1x64x128xf32, #tpu.memory_space<vmem>>, vector<1x1x64x128xf32>
        %57 = vector.shape_cast %56 : vector<1x1x64x128xf32> to vector<64x128xf32>
        %58 = arith.maximumf %57, %55 : vector<64x128xf32>
        %c0_21 = arith.constant 0 : index
        %c0_22 = arith.constant 0 : index
        %c0_23 = arith.constant 0 : index
        %c0_24 = arith.constant 0 : index
        %59 = vector.load %arg4[%c0_21, %c0_22, %c0_23, %c0_24] : memref<1x1x64x128xf32, #tpu.memory_space<vmem>>, vector<1x1x64x128xf32>
        %60 = vector.shape_cast %59 : vector<1x1x64x128xf32> to vector<64x128xf32>
        %61 = vector.shape_cast %58 : vector<64x128xf32> to vector<1x1x64x128xf32>
        tpu.vector_store %arg4[%c0_21, %c0_22, %c0_23, %c0_24], %61 {strides = array<i32>} : memref<1x1x64x128xf32, #tpu.memory_space<vmem>>, vector<1x1x64x128xf32>,
      } else {
      }
    }
    return
  }
  func.func @transform_0(%arg0: i32, %arg1: i32, %arg2: memref<2xi32, #tpu.memory_space<smem>>) -> (i32, i32, i32) {
    %c0_i32 = arith.constant 0 : i32
    %c0_i32_0 = arith.constant 0 : i32
    %c0_i32_1 = arith.constant 0 : i32
    return %arg0, %c0_i32, %c0_i32_0 : i32, i32, i32
  }
  func.func @transform_1(%arg0: i32, %arg1: i32, %arg2: memref<2xi32, #tpu.memory_space<smem>>) -> (i32, i32, i32, i32) {
    %c0_i32 = arith.constant 0 : i32
    %c0_i32_0 = arith.constant 0 : i32
    %c0_i32_1 = arith.constant 0 : i32
    return %arg0, %c0_i32, %arg1, %c0_i32_0 : i32, i32, i32, i32
  }
}

</mosaic_0001>

<bundles_post_ra>
// kernel: tpu_custom_call.1
= control target key start
LH: loop header
LB: loop body
LE: loop exit
PB: predicated region body
PF: predicated region fallthrough
CT: control target
= control target key end

     0   :  { %s1026_s0 = inlined_call_operand.vmem [shape: s32[2], index: 0, kind: input, shape index: {}]   ;;  %s1027_s1 = inlined_call_operand.vmem [shape: f32[2,5,8], index: 1, kind: input, shape index: {}]   ;;  %s1028_s2 = inlined_call_operand.hbm [shape: f32[2,1,64,128], index: 2, kind: output, shape index: {}]  }
   0x1   :  { %1030 = sst [smem:[#allocation12_spill]] %s1027_s1  ;;  %s7_s11 = sshll.u32 %s1026_s0, 4  ;;  %s8_s11 = int_to_ptr.vmem [resolvable:$true] %s7_s11 }
   0x2   :  { %s537_s12 = scalar_lea.vmem %s8_s11, 16  ;;  %p542_p1 = scmp.lt.s32.totalorder %s8_s11, %s8_s11 }
   0x3   :  { %p538_p0 = scmp.ne.s32.totalorder %s8_s11, %s537_s12  ;;  %p543_p2 = scmp.lt.s32.totalorder %s537_s12, %s537_s12 }
   0x5   :  { %p544_p3 = por %p543_p2, %p542_p1 }
   0x7   :  { %p545_p4 = pnand %p544_p3, %p538_p0 }
   0x9   :  { %548 = shalt.err (!%p545_p4)  }
   0xa   :  { %s656_s13 = smov [#allocation3]  }
   0xb   :  { %10 = dma.vmem_to_smem %s8_s11, 16, %s656_s13, [#allocation2] }
   0xc   :  { %618 = dma.done.wait [#allocation2], 16 }
   0xd   :  { %619 = vsyncadd [#allocation2], 4294967280 }
   0xe   :  { %12 = sfence }
   0xf   :  { %13 = vsyncpa [#allocation6], 0 }
  0x10   :  { %15 = vsyncpa [#allocation6 + $0x1], 0 }
  0x11   :  { %16 = vsyncpa [#allocation5], 0 }
  0x12   :  { %18 = vsyncpa [#allocation5 + $0x1], 0  ;;  %s680_s14 = smov 0   ;;  %s682_s0 = smov 0  }
  0x13   :  { %s684_s15 = smov 0   ;;  %s686_s16 = smov 0  }
  0x14   :  { %s688_s17 = smov 0   ;;  %s690_s18 = smov 0  }
  0x15 LB: > { %s425_s19 = sadd.s32 4294967295, %s650_s18   ;;  %s426_s20 = sadd.s32 4294967294, %s650_s18   ;;  %s650_s18 = sphi %s690_s18, %s24_s18   ;;  %s646_s17 = sphi %s688_s17, %s1066_s17   ;;  %s642_s16 = sphi %s686_s16, %s1065_s16   ;;  %s638_s15 = sphi %s684_s15, %s1064_s15   ;;  %s634_s0 = sphi %s682_s0, %s1063_s0   ;;  %s630_s14 = sphi %s680_s14, %s1062_s14  }
  0x16   : > { %s36_s21 = sadd.s32 1, %s646_s17  ;;  %s43_s22 = sadd.s32 1, %s638_s15 }
  0x17   : > { %p38_p5 = scmp.ge.s32.totalorder %s36_s21, 2  ;;  %p50_p6 = scmp.ne.s32.totalorder %s638_s15, %s634_s0 }
  0x18   : > { %p51_p7 = scmp.eq.s32.totalorder %s650_s18, 0  ;;  %p56_p8 = scmp.ne.s32.totalorder %s634_s0, %s630_s14 }
  0x19   : > { %s1068_s21 = smov (%p38_p5, %s36_s21), 0  ;;  %p57_p10 = scmp.eq.s32.totalorder %s425_s19, 0 }
  0x1a   : > { %1031 = sst [smem:[#allocation11_spill]] %s1068_s21  ;;  %p721_p9 = por %p51_p7, %p50_p6 }
  0x1b   : > { %s40_s24 = ssub.s32 %s646_s17, %s1068_s21  ;;  %p82_p11 = scmp.eq.s32.totalorder %s425_s19, 1 }
  0x1c   : > { %p41_p12 = scmp.eq.s32.totalorder %s40_s24, 0  ;;  %p727_p13 = por %p57_p10, %p56_p8 }
  0x1d   : > { %p731_p0 = por %p82_p11, %p50_p6  ;;  %p88_p1 = scmp.eq.s32.totalorder %s426_s20, 1 }
  0x1e   : > { %s736_s27 = scalar_select %p41_p12, %s638_s15, %s43_s22  }
  0x1f   : > { %p738_p2 = por %p88_p1, %p56_p8  ;;  %p474_p4 = scmp.lt.s32.totalorder %s650_s18, 2 }
  0x20   : > { %s108_s29 = sand.u32 1, %s638_s15   ;;  %s430_s3 = sshll.u32 %s646_s17, 3 }
  0x21   : > { %s429_s30 = sshll.u32 %s108_s29, 10  ;;  %s1036_s1 = sld [smem:[#allocation12_spill]] }
  0x22   : > { %p751_p5 = pnand %p474_p4, %p721_p9  ;;  %p431_p6 = scmp.ge.s32.totalorder %s650_s18, 1 }
  0x23   : > { %s112_s9 = scalar_lea.smem [#allocation4], %s429_s30  ;;  %s109_s10 = scalar_lea.sflag [#allocation6], %s108_s29 }
  0x24   : > { %p551_p8 = pneg %p751_p5 }
  0x27   : > { %s117_s6 = scalar_lea.vmem %s1036_s1, %s430_s3  ;;  %s554_s19 = sshll.u32 %s1036_s1, 4  ;;  %s555_s19 = int_to_ptr.vmem [resolvable:$false] %s554_s19 }
  0x28   : > { %s119_s8 = sshll.u32 %s117_s6, 4  ;;  %s556_s20 = scalar_lea.vmem %s555_s19, 256  ;;  %s120_s8 = int_to_ptr.vmem [resolvable:$true] %s119_s8 }
  0x29   : > { %s549_s11 = scalar_lea.vmem %s120_s8, 128  ;;  %p557_p9 = scmp.lt.s32.totalorder %s120_s8, %s555_s19 }
  0x2a   : > { %p550_p7 = scmp.ne.s32.totalorder %s120_s8, %s549_s11  ;;  %p558_p12 = scmp.lt.s32.totalorder %s556_s20, %s549_s11 }
  0x2c   : > { %p552_p10 = pnand %p551_p8, %p550_p7  ;;  %p559_p1 = por %p558_p12, %p557_p9 }
  0x2e   : > { %p553_p11 = pneg %p552_p10 }
  0x30   : > { %p560_p4 = pnand %p559_p1, %p553_p11 }
  0x32   : > { %563 = shalt.err (!%p560_p4)
}
  0x33   : > { %469 = dma.vmem_to_smem (!%p751_p5), %s120_s8, 128, %s112_s9, %s109_s10  }
  0x34   : > { %p124_p3 = scmp.lt.s32.totalorder %s650_s18, 3 }
  0x36   : > { %p125_p7 = pnand %p431_p6, %p124_p3 }
  0x37   : > { %s767_s22 = sand.u32 (!%p125_p7), 1, %s634_s0  }
  0x38   : > { %128 = sbr.rel (%p125_p7) target bundleno = 149 (0x95), region = 24  ;;  %s432_s23 = sshll.u32 (!%p125_p7), %s767_s22, 10 }
  0x39   : > { %s131_s24 = scalar_lea.sflag (!%p125_p7), [#allocation6], %s767_s22  ;;  %s771_s29 = scalar_lea.smem (!%p125_p7), [#allocation4], %s432_s23 }
  0x3d   : > { %621 = dma.done.wait (%p727_p13), %s131_s24, 128  }
  0x3e   : > { %623 = vsyncadd (%p727_p13), %s131_s24, 4294967168 }
  0x3f   : > { %139 = sfence }
  0x40   : > { %s433_s30 = sshll.u32 %s767_s22, 6  ;;  %v156_v0 = vlaneseq  ;;  %s779_s3 = sld [smem:[#allocation3 + %s642_s16]]  ;;  %v657_v2 = vmov 0.0  }
  0x41   : > { %s783_s4 = scalar_lea.vmem [#allocation7], %s433_s30 }
  0x42   : > { %v781_v1 = vshrl.u32 %v156_v0, 7  ;;  %188 = vst [vmem:[%s783_s4] sm:$0xff] %v657_v2  ;;  %189 = vst [vmem:[%s783_s4 + $0x8] sm:$0xff] %v657_v2  ;;  %v793_v3 = vand.u32 127, %v156_v0 }
  0x43   : > { %190 = vst [vmem:[%s783_s4 + $0x10] sm:$0xff] %v657_v2  ;;  %191 = vst [vmem:[%s783_s4 + $0x18] sm:$0xff] %v657_v2 }
  0x44   : > { %192 = vst [vmem:[%s783_s4 + $0x20] sm:$0xff] %v657_v2  ;;  %193 = vst [vmem:[%s783_s4 + $0x28] sm:$0xff] %v657_v2  ;;  %v796_v4 = vadd.s32 8, %v781_v1  ;;  %v799_v5 = vadd.s32 16, %v781_v1  ;;  %v802_v6 = vadd.s32 24, %v781_v1  ;;  %v805_v7 = vadd.s32 32, %v781_v1 }
  0x45   : > { %194 = vst [vmem:[%s783_s4 + $0x30] sm:$0xff] %v657_v2  ;;  %195 = vst [vmem:[%s783_s4 + $0x38] sm:$0xff] %v657_v2  ;;  %v808_v8 = vadd.s32 40, %v781_v1  ;;  %v811_v9 = vadd.s32 48, %v781_v1  ;;  %v814_v10 = vadd.s32 56, %v781_v1  ;;  %v174_v11 = vcvt.s32.f32 %v781_v1 }
  0x46   : > { %v175_v12 = vcvt.s32.f32 %v796_v4  ;;  %v176_v13 = vcvt.s32.f32 %v799_v5  ;;  %v177_v14 = vcvt.s32.f32 %v802_v6  ;;  %v178_v15 = vcvt.s32.f32 %v805_v7  ;;  %p434_p13 = scmp.le.s32.totalorder %s779_s3, 0 }
  0x47   : > { %v179_v16 = vcvt.s32.f32 %v808_v8  ;;  %v180_v17 = vcvt.s32.f32 %v811_v9  ;;  %v181_v18 = vcvt.s32.f32 %v814_v10  ;;  %v184_v19 = vcvt.s32.f32 %v793_v3  ;;  %s826_s25 = smov (!%p434_p13), 0  }
  0x48   : > { %390 = sbr.rel (%p434_p13) target bundleno = 125 (0x7d), region = 74 }
  0x4d LB: >> { %s203_s5 = sld [smem:[%s771_s29 + %s654_s25]]  ;;  %s204_s6 = sshra.s32 %s654_s25, 7  ;;  %s654_s25 = sphi %s826_s25, %s200_s25  }
  0x4e   : >> { %s453_s7 = sshll.u32 %s204_s6, 7  ;;  %s209_s8 = sand.u32 127, %s654_s25 }
  0x4f   : >> { %s454_s9 = sadd.s32 128, %s453_s7  ;;  %s456_s10 = sadd.s32 256, %s453_s7 }
  0x50   : >> { %s210_s11 = sadd.s32 %s454_s9, %s209_s8  ;;  %s214_s12 = sadd.s32 %s456_s10, %s209_s8 }
  0x51   : >> { %s211_s13 = sld [smem:[%s771_s29 + %s210_s11]]  ;;  %s458_s19 = sadd.s32 384, %s453_s7 }
  0x52   : >> { %s215_s20 = sld [smem:[%s771_s29 + %s214_s12]]  ;;  %s218_s23 = sadd.s32 %s458_s19, %s209_s8 }
  0x53   : >> { %s219_s24 = sld [smem:[%s771_s29 + %s218_s23]]  ;;  %s460_s30 = sadd.s32 512, %s453_s7 }
  0x54   : >> { %s222_s1 = sadd.s32 %s460_s30, %s209_s8 }
  0x55   : >> { %s223_s21 = sld [smem:[%s771_s29 + %s222_s1]] }
  0x57   : >> { %p225_p3 = scmp.lt.f32.partialorder %s211_s13, 64.0 }
  0x59   : >> { %p224_p5 = scmp.gt.f32.partialorder %s219_s24, 0.0 }
  0x5b   : >> { %p226_p6 = pnand %p225_p3, %p224_p5 }
  0x5d   : >> { %229 = sbr.rel (%p226_p6) target bundleno = 117 (0x75), region = 39 }
  0x62   : >> { %v230_v20 = vstv %s211_s13  ;;  %v239_v21 = vstv %s219_s24  ;;  %v839_v22 = vstv %s223_s21  ;;  %v281_v23 = vstv %s203_s5 }
  0x63   : >> { %vm231_vm0 = vcmp.ge.f32.partialorder %v174_v11, %v230_v20  ;;  %vm240_vm1 = vcmp.lt.f32.partialorder %v174_v11, %v239_v21  ;;  %v283_v24 = vstv %s215_s20  ;;  %vm282_vm3 = vcmp.ge.f32.partialorder %v184_v19, %v281_v23  ;;  %v296_v34 = vld [vmem:[%s783_s4] sm:$0xff]  ;;  %v297_v43 = vld [vmem:[%s783_s4 + $0x8] sm:$0xff]  ;;  %v298_v50 = vld [vmem:[%s783_s4 + $0x10] sm:$0xff] }
  0x64   : >> { %vm248_vm2 = vmand %vm231_vm0, %vm240_vm1  ;;  %vm284_vm4 = vcmp.lt.f32.partialorder %v184_v19, %v283_v24  ;;  %vm232_vm5 = vcmp.ge.f32.partialorder %v175_v12, %v230_v20  ;;  %vm241_vm6 = vcmp.lt.f32.partialorder %v175_v12, %v239_v21  ;;  %v658_v25 = vmov 0.0   ;;  %v299_v54 = vld [vmem:[%s783_s4 + $0x18] sm:$0xff]  ;;  %v300_v59 = vld [vmem:[%s783_s4 + $0x20] sm:$0xff] }
  0x65   : >> { %v439_v26 = vsel %vm248_vm2, 1.0, %v658_v25  ;;  %vm285_vm7 = vmand %vm282_vm3, %vm284_vm4  ;;  %vm855_vm8 = vcmp.ge.f32.partialorder %v176_v13, %v230_v20  ;;  %vm861_vm9 = vcmp.lt.f32.partialorder %v176_v13, %v239_v21  ;;  %vm867_vm10 = vcmp.ge.f32.partialorder %v177_v14, %v230_v20  ;;  %v301_v0 = vld [vmem:[%s783_s4 + $0x28] sm:$0xff]  ;;  %v302_v24 = vld [vmem:[%s783_s4 + $0x30] sm:$0xff] }
  0x66   : >> { %v273_v30 = vmul.f32 %v439_v26, %v839_v22  ;;  %v447_v31 = vsel %vm285_vm7, 1.0, %v658_v25  ;;  %vm249_vm11 = vmand %vm232_vm5, %vm241_vm6  ;;  %vm874_vm12 = vcmp.lt.f32.partialorder %v177_v14, %v239_v21  ;;  %vm880_vm13 = vcmp.ge.f32.partialorder %v178_v15, %v230_v20  ;;  %v303_v29 = vld [vmem:[%s783_s4 + $0x38] sm:$0xff] }
  0x67   : >> { %v440_v35 = vsel %vm249_vm11, 1.0, %v658_v25  ;;  %vm250_vm14 = vmand %vm855_vm8, %vm861_vm9  ;;  %vm891_vm15 = vcmp.lt.f32.partialorder %v178_v15, %v239_v21  ;;  %vm897_vm0 = vcmp.ge.f32.partialorder %v179_v16, %v230_v20  ;;  %vm903_vm1 = vcmp.lt.f32.partialorder %v179_v16, %v239_v21 }
  0x68   : >> { %v288_v39 = vmul.f32 %v447_v31, %v273_v30  ;;  %v274_v40 = vmul.f32 %v440_v35, %v839_v22  ;;  %v441_v41 = vsel %vm250_vm14, 1.0, %v658_v25  ;;  %vm251_vm2 = vmand %vm867_vm10, %vm874_vm12  ;;  %vm914_vm3 = vcmp.ge.f32.partialorder %v180_v17, %v230_v20 }
  0x69   : >> { %v275_v44 = vmul.f32 %v441_v41, %v839_v22  ;;  %v442_v45 = vsel %vm251_vm2, 1.0, %v658_v25  ;;  %vm252_vm4 = vmand %vm880_vm13, %vm891_vm15  ;;  %vm926_vm5 = vcmp.lt.f32.partialorder %v180_v17, %v239_v21  ;;  %vm932_vm6 = vcmp.ge.f32.partialorder %v181_v18, %v230_v20 }
  0x6a   : >> { %v304_v48 = vmax.f32 %v296_v34, %v288_v39  ;;  %v289_v49 = vmul.f32 %v447_v31, %v274_v40  ;;  %v276_v51 = vmul.f32 %v442_v45, %v839_v22  ;;  %v443_v52 = vsel %vm252_vm4, 1.0, %v658_v25  ;;  %vm253_vm7 = vmand %vm897_vm0, %vm903_vm1 }
  0x6b   : >> { %v290_v53 = vmul.f32 %v447_v31, %v275_v44  ;;  %v277_v55 = vmul.f32 %v443_v52, %v839_v22  ;;  %v444_v56 = vsel %vm253_vm7, 1.0, %v658_v25  ;;  %vm254_vm8 = vmand %vm914_vm3, %vm926_vm5  ;;  %vm247_vm9 = vcmp.lt.f32.partialorder %v181_v18, %v239_v21 }
  0x6c   : >> { %312 = vst [vmem:[%s783_s4] sm:$0xff] %v304_v48  ;;  %v305_v57 = vmax.f32 %v297_v43, %v289_v49  ;;  %v291_v58 = vmul.f32 %v447_v31, %v276_v51  ;;  %v278_v60 = vmul.f32 %v444_v56, %v839_v22  ;;  %v445_v61 = vsel %vm254_vm8, 1.0, %v658_v25  ;;  %vm255_vm10 = vmand %vm932_vm6, %vm247_vm9 }
  0x6d   : >> { %v306_v62 = vmax.f32 %v298_v50, %v290_v53  ;;  %v292_v63 = vmul.f32 %v447_v31, %v277_v55  ;;  %v279_v2 = vmul.f32 %v445_v61, %v839_v22  ;;  %v446_v20 = vsel %vm255_vm10, 1.0, %v658_v25 }
  0x6e   : >> { %313 = vst [vmem:[%s783_s4 + $0x8] sm:$0xff] %v305_v57  ;;  %v307_v21 = vmax.f32 %v299_v54, %v291_v58  ;;  %v293_v23 = vmul.f32 %v447_v31, %v278_v60  ;;  %v280_v26 = vmul.f32 %v446_v20, %v839_v22 }
  0x6f   : >> { %314 = vst [vmem:[%s783_s4 + $0x10] sm:$0xff] %v306_v62  ;;  %v308_v27 = vmax.f32 %v300_v59, %v292_v63  ;;  %v294_v28 = vmul.f32 %v447_v31, %v279_v2 }
  0x70   : >> { %315 = vst [vmem:[%s783_s4 + $0x18] sm:$0xff] %v307_v21  ;;  %v309_v30 = vmax.f32 %v301_v0, %v293_v23  ;;  %v295_v32 = vmul.f32 %v447_v31, %v280_v26 }
  0x71   : >> { %316 = vst [vmem:[%s783_s4 + $0x20] sm:$0xff] %v308_v27  ;;  %v310_v33 = vmax.f32 %v302_v24, %v294_v28 }
  0x72   : >> { %317 = vst [vmem:[%s783_s4 + $0x28] sm:$0xff] %v309_v30  ;;  %v311_v34 = vmax.f32 %v303_v29, %v295_v32 }
  0x73   : >> { %318 = vst [vmem:[%s783_s4 + $0x30] sm:$0xff] %v310_v33 }
  0x74   : >> { %319 = vst [vmem:[%s783_s4 + $0x38] sm:$0xff] %v311_v34 }
  0x75 PF: >> { %s200_s25 = sadd.s32 1, %s654_s25  }
  0x76   : >> { %p199_p8 = scmp.ge.s32.totalorder %s200_s25, %s779_s3 }
  0x78   : > { %202 = sbr.rel (!%p199_p8) target bundleno = 77 (0x4d), region = 80 }
  0x7d PF: > { %s461_s1 = sshll.u32 %s642_s16, 10  ;;  %s336_s7 = sshll.u32 %s783_s4, 4  ;;  %s978_s7 = int_to_ptr.vmem [resolvable:$true] %s336_s7 }
  0x7e   : > { %s975_s6 = scalar_lea.hbm %s1028_s2, %s461_s1  ;;  %s321_s8 = scalar_lea.sflag [#allocation5], %s767_s22 }
  0x7f   : > { %s564_s25 = scalar_lea.vmem %s978_s7, 1024  ;;  %s659_s29 = smov [#allocation7]  }
  0x80   : > { %p565_p10 = scmp.ne.s32.totalorder %s978_s7, %s564_s25  ;;  %s568_s3 = sshll.u32 %s659_s29, 4  ;;  %s569_s3 = int_to_ptr.vmem [resolvable:$false] %s568_s3 }
  0x81   : > { %s570_s16 = scalar_lea.vmem %s569_s3, 2048  ;;  %p571_p12 = scmp.lt.s32.totalorder %s978_s7, %s569_s3 }
  0x82   : > { %p566_p11 = pnand %p565_p10, %p731_p0  ;;  %p572_p1 = scmp.lt.s32.totalorder %s570_s16, %s564_s25 }
  0x84   : > { %p567_p9 = pneg %p566_p11  ;;  %p573_p4 = por %p572_p1, %p571_p12 }
  0x86   : > { %p574_p7 = pnand %p573_p4, %p567_p9 }
  0x88   : > { %577 = shalt.err (!%p574_p7)
}
  0x89   : > { %s578_s4 = scalar_lea.hbm %s975_s6, 1024  ;;  %s582_s11 = scalar_lea.hbm %s1028_s2, 2048 }
  0x8a   : > { %p579_p13 = scmp.ne.s32.totalorder %s975_s6, %s578_s4  ;;  %p583_p6 = scmp.lt.s32.totalorder %s975_s6, %s1028_s2 }
  0x8b   : > { %p584_p8 = scmp.lt.s32.totalorder %s582_s11, %s578_s4 }
  0x8c   : > { %p580_p3 = pnand %p579_p13, %p731_p0 }
  0x8d   : > { %p585_p10 = por %p584_p8, %p583_p6 }
  0x8e   : > { %p581_p5 = pneg %p580_p3 }
  0x90   : > { %p586_p11 = pnand %p585_p10, %p581_p5 }
  0x92   : > { %589 = shalt.err (!%p586_p11)
}
  0x93   : > { %s660_s19 = smov 128   ;;  %s661_s20 = smov 8  }
  0x94   : > { %464 = dma.vmem_to_hbm [thread:$0]  (%p731_p0), %s978_s7, 1024, %s975_s6, %s321_s8, %s660_s19, %s660_s19, %s661_s20  }
  0x95 PF: > { %s351_s23 = sand.u32 1, %s630_s14   ;;  %p1060_p9 = scmp.ge.s32.totalorder %s650_s18, 2 }
  0x96   : > { %s352_s24 = scalar_lea.sflag [#allocation5], %s351_s23 }
  0x97   : > { %p471_p12 = pnand %p1060_p9, %p738_p2 }
  0x99   : > { %p472_p1 = pneg %p471_p12 }
  0x9b   : > { %625 = dma.done.wait (%p472_p1), %s352_s24, 1024  }
  0x9c   : > { %627 = vsyncadd (%p472_p1), %s352_s24, 4294966272  ;;  %s24_s18 = sadd.s32 1, %s650_s18   ;;  %s1061_s26 = sld [smem:[#allocation11_spill]] }
  0x9d   : > { %p21_p4 = scmp.ge.s32.totalorder %s24_s18, 4   ;;  %s1062_s14 = smov %s634_s0 }
  0x9e   : > { %s1063_s0 = smov %s638_s15  ;;  %s1064_s15 = smov %s736_s27 }
  0x9f   : > { %s1065_s16 = smov %s646_s17  ;;  %23 = sbr.rel (!%p21_p4) target bundleno = 21 (0x15), region = 91 }
  0xa2   : > { %s1066_s17 = smov %s1061_s26 }
  0xa4   :  { %357 = vsyncpa [#allocation5], 1 }
  0xa5   :  { %359 = vsyncpa [#allocation5 + $0x1], 1 }
  0xa6   :  { %360 = vsyncpa [#allocation6], 1 }
  0xa7   :  { %362 = vsyncpa [#allocation6 + $0x1], 1 }

</bundles_post_ra>
